<compile_context>
chip_gen: v5e
topology: v5e:2x2
jax: 0.10.0
libtpu: 0.0.40
codegen_flags: <defaults>
</compile_context>

<pallas_src>
import math

import jax
import jax.numpy as jnp
from jax.experimental import pallas as pl
from jax.experimental.pallas import tpu as pltpu

_LN_EPS = 1e-5


def _layer_norm(z, gamma, beta):
    """LayerNorm over the last axis (biased variance, eps=1e-5), f32 math."""
    mu = jnp.mean(z, axis=-1, keepdims=True)
    zc = z - mu
    var = jnp.mean(zc * zc, axis=-1, keepdims=True)
    inv = jax.lax.rsqrt(var + _LN_EPS)
    return zc * inv * gamma + beta


# ---------------------------------------------------------------------------
# Fused kernel: attention + AddNorm1 + PositionWiseFFN + AddNorm2 per batch b.
# ---------------------------------------------------------------------------
def _encoder_block_kernel(x_ref, w_ref, g1_ref, be1_ref,
                          w1t_ref, b1_ref, w2t_ref, b2_ref,
                          g2_ref, be2_ref,
                          z_ref, s_ref):
    # ---- single-head attention with q = k = v = x * diag(w) ----
    x = x_ref[0].astype(jnp.float32)               # (S, D)
    w = w_ref[...].astype(jnp.float32)             # (1, D)  hoisted single load
    q = x * w                                      # (S, D)
    q_bf = q.astype(jnp.bfloat16)                  # bf16 MXU operands

    scale = 1.0 / math.sqrt(x.shape[-1])
    scores = jax.lax.dot_general(                  # q @ q^T on the MXU (bf16 in, f32 acc)
        q_bf, q_bf, (((1,), (1,)), ((), ())),
        preferred_element_type=jnp.float32) * scale
    s_ref[0] = scores.astype(s_ref.dtype)          # pre-softmax scores (returned)

    m = jnp.max(scores, axis=-1, keepdims=True)
    p = jnp.exp(scores - m)
    inv_l = pl.reciprocal(jnp.sum(p, axis=-1, keepdims=True), approx=True)
    attn = p * inv_l
    out = jnp.dot(attn.astype(jnp.bfloat16), q_bf,
                  preferred_element_type=jnp.float32)   # (S, D)

    # ---- AddNorm1: LayerNorm(dropout(out) + x), dropout = identity ----
    y = _layer_norm(out + x, g1_ref[...], be1_ref[...])

    # ---- PositionWiseFFN: dense1 -> ReLU -> dense2 (pre-transposed bf16 weights) ----
    h = jnp.dot(y.astype(jnp.bfloat16), w1t_ref[...],       # [S,D]@[D,H]
                preferred_element_type=jnp.float32)
    h = jnp.maximum(h + b1_ref[...], 0.0)
    f = jnp.dot(h.astype(jnp.bfloat16), w2t_ref[...],       # [S,H]@[H,D]
                preferred_element_type=jnp.float32)

    # ---- AddNorm2: LayerNorm(ffn(y) + y) ----
    z_ref[0] = _layer_norm(f + b2_ref[...] + y,
                           g2_ref[...], be2_ref[...]).astype(z_ref.dtype)


def _default_vmem_limit_bytes():
    # ~96 MiB on 128-MiB chips (v5e/v6e), ~48 MiB on v7x (64 MiB physical).
    try:
        cap = int(pltpu.get_tpu_info().vmem_capacity_bytes)
        return min((cap * 3) // 4, 96 * 1024 * 1024)
    except Exception:
        return 48 * 1024 * 1024


# ---------------------------------------------------------------------------
# Wrapper: full EncoderBlock forward.
# ---------------------------------------------------------------------------
def encoder_block_forward(x, w_attn, gamma1, beta1, w1, b1, w2, b2,
                          gamma2, beta2, *, vmem_limit_bytes=None):
    """Pallas-TPU forward of EncoderBlock (num_heads == 1, eval-mode dropout).

    x:       (B, S, D) activations.
    w_attn:  (1, D)   the module's `self.w` (diagonal attention scaling).
    gamma*/beta*: (D,) LayerNorm parameters.
    w1: (H, D), b1: (H,), w2: (D, H), b2: (D,) — PyTorch nn.Linear layout.
    Returns (z, scores, w_attn), matching the PyTorch module.
    """
    B, S, D = x.shape
    H = w1.shape[0]
    assert w1.shape == (H, D) and w2.shape == (D, H)
    if vmem_limit_bytes is None:
        vmem_limit_bytes = _default_vmem_limit_bytes()

    f32 = jnp.float32
    bf16 = jnp.bfloat16
    w_2d = w_attn.reshape(1, D).astype(f32)
    g1_2d = gamma1.reshape(1, D).astype(f32)
    be1_2d = beta1.reshape(1, D).astype(f32)
    g2_2d = gamma2.reshape(1, D).astype(f32)
    be2_2d = beta2.reshape(1, D).astype(f32)
    b1_2d = b1.reshape(1, H).astype(f32)
    b2_2d = b2.reshape(1, D).astype(f32)
    # One-time wrapper-side transpose + bf16 cast: both FFN matmuls become
    # plain [M,K]@[K,N] bf16 MXU feeds, weights stay VMEM-resident across
    # grid steps (constant index_maps), half the weight DMA/VMEM of f32.
    w1t = jnp.transpose(w1).astype(bf16)    # (D, H)
    w2t = jnp.transpose(w2).astype(bf16)    # (H, D)

    cost = pl.CostEstimate(
        flops=B * (4 * S * S * D + 4 * S * D * H),
        transcendentals=B * (S * S + 4 * S),
        bytes_accessed=4 * (2 * B * S * D + B * S * S + 6 * D + H) + 2 * 2 * D * H)

    resident = lambda b: (0, 0)   # params stay VMEM-resident across grid steps

    z, scores = pl.pallas_call(
        _encoder_block_kernel,
        out_shape=(jax.ShapeDtypeStruct((B, S, D), x.dtype),
                   jax.ShapeDtypeStruct((B, S, S), jnp.float32)),
        grid_spec=pltpu.PrefetchScalarGridSpec(
            num_scalar_prefetch=0,
            grid=(B,),
            in_specs=[
                pl.BlockSpec((1, S, D), lambda b: (b, 0, 0)),  # x
                pl.BlockSpec((1, D), resident),                # w (attention diag)
                pl.BlockSpec((1, D), resident),                # gamma1
                pl.BlockSpec((1, D), resident),                # beta1
                pl.BlockSpec((D, H), resident),                # W1^T (bf16)
                pl.BlockSpec((1, H), resident),                # b1
                pl.BlockSpec((H, D), resident),                # W2^T (bf16)
                pl.BlockSpec((1, D), resident),                # b2
                pl.BlockSpec((1, D), resident),                # gamma2
                pl.BlockSpec((1, D), resident),                # beta2
            ],
            out_specs=[
                pl.BlockSpec((1, S, D), lambda b: (b, 0, 0)),  # z
                pl.BlockSpec((1, S, S), lambda b: (b, 0, 0)),  # scores
            ],
        ),
        compiler_params=pltpu.CompilerParams(
            dimension_semantics=("parallel",),
            vmem_limit_bytes=vmem_limit_bytes),
        cost_estimate=cost,
    )(x, w_2d, g1_2d, be1_2d, w1t, b1_2d, w2t, b2_2d, g2_2d, be2_2d)

    return z, scores, w_attn


# ---------------------------------------------------------------------------
# Pure-JAX reference (same math as the PyTorch module, eval-mode dropout).
# ---------------------------------------------------------------------------
def _layer_norm_ref(v, g, b, eps=_LN_EPS):
    mu = jnp.mean(v, axis=-1, keepdims=True)
    var = jnp.mean((v - mu) ** 2, axis=-1, keepdims=True)
    return (v - mu) / jnp.sqrt(var + eps) * g + b


def encoder_block_reference(x, w_attn, gamma1, beta1, w1, b1, w2, b2,
                            gamma2, beta2):
    hi = jax.lax.Precision.HIGHEST
    D = x.shape[-1]
    q = x * w_attn.reshape(1, 1, D)
    scores = jnp.einsum("bqd,bkd->bqk", q, q, precision=hi) / math.sqrt(D)
    attn = jax.nn.softmax(scores, axis=-1)
    out = jnp.einsum("bqk,bkd->bqd", attn, q, precision=hi)
    y = _layer_norm_ref(out + x, gamma1, beta1)
    h = jnp.maximum(jnp.einsum("bsd,hd->bsh", y, w1, precision=hi) + b1, 0.0)
    f = jnp.einsum("bsh,dh->bsd", h, w2, precision=hi) + b2
    z = _layer_norm_ref(f + y, gamma2, beta2)
    return z, scores, w_attn


if __name__ == "__main__":
    # Small shapes consistent with the module (d_model = 175, num_heads = 1).
    batch, seq = 2, 8
    d_model = 175          # query/key/value_size = norm_shape = ffn_num_input
    ffn_hidden = 256

    key = jax.random.PRNGKey(0)
    ks = jax.random.split(key, 10)
    x = jax.random.normal(ks[0], (batch, seq, d_model), dtype=jnp.float32)
    w_attn = jax.random.normal(ks[1], (1, d_model), jnp.float32) * 0.3
    gamma1 = 1.0 + 0.1 * jax.random.normal(ks[2], (d_model,), jnp.float32)
    beta1 = 0.1 * jax.random.normal(ks[3], (d_model,), jnp.float32)
    w1 = jax.random.normal(ks[4], (ffn_hidden, d_model), jnp.float32) * 0.1
    b1 = jax.random.normal(ks[5], (ffn_hidden,), jnp.float32) * 0.1
    w2 = jax.random.normal(ks[6], (d_model, ffn_hidden), jnp.float32) * 0.1
    b2 = jax.random.normal(ks[7], (d_model,), jnp.float32) * 0.1
    gamma2 = 1.0 + 0.1 * jax.random.normal(ks[8], (d_model,), jnp.float32)
    beta2 = 0.1 * jax.random.normal(ks[9], (d_model,), jnp.float32)

    z, scores, w_out = encoder_block_forward(
        x, w_attn, gamma1, beta1, w1, b1, w2, b2, gamma2, beta2)
    z = jax.block_until_ready(z)
    scores = jax.block_until_ready(scores)

    z_ref, scores_ref, _ = encoder_block_reference(
        x, w_attn, gamma1, beta1, w1, b1, w2, b2, gamma2, beta2)

    assert z.shape == (batch, seq, d_model)
    assert scores.shape == (batch, seq, seq)
    assert w_out.shape == (1, d_model)
    # Tolerances loosened for bf16 MXU operands (f32 accumulation).
    assert jnp.allclose(scores, scores_ref, atol=1e-2, rtol=1e-2), \
        float(jnp.max(jnp.abs(scores - scores_ref)))
    assert jnp.allclose(z, z_ref, atol=6e-2, rtol=5e-2), \
        float(jnp.max(jnp.abs(z - z_ref)))

    print("KERNEL_OK")
</pallas_src>

<mosaic_0001>
module attributes {stable_mosaic.version = 11 : i64} {
  func.func @_encoder_block_kernel(%arg0: i32, %arg1: memref<1x8x175xf32, #tpu.memory_space<vmem>>, %arg2: memref<1x175xf32, #tpu.memory_space<vmem>>, %arg3: memref<1x175xf32, #tpu.memory_space<vmem>>, %arg4: memref<1x175xf32, #tpu.memory_space<vmem>>, %arg5: memref<175x256xbf16, #tpu.memory_space<vmem>>, %arg6: memref<1x256xf32, #tpu.memory_space<vmem>>, %arg7: memref<256x175xbf16, #tpu.memory_space<vmem>>, %arg8: memref<1x175xf32, #tpu.memory_space<vmem>>, %arg9: memref<1x175xf32, #tpu.memory_space<vmem>>, %arg10: memref<1x175xf32, #tpu.memory_space<vmem>>, %arg11: memref<1x8x175xf32, #tpu.memory_space<vmem>>, %arg12: memref<1x8x8xf32, #tpu.memory_space<vmem>>) attributes {dimension_semantics = [#tpu.dimension_semantics<parallel>], iteration_bounds = array<i64: 2>, scalar_prefetch = 0 : i64, scratch_operands = 0 : i64, tpu.core_type = #tpu.core_type<tc>, window_params = [{transform_indices = @transform_0, window_bounds = array<i64: 1, 8, 175>}, {pipeline_mode = #tpu.pipeline_mode<synchronous>, transform_indices = @transform_1, window_bounds = array<i64: 1, 175>}, {pipeline_mode = #tpu.pipeline_mode<synchronous>, transform_indices = @transform_2, window_bounds = array<i64: 1, 175>}, {pipeline_mode = #tpu.pipeline_mode<synchronous>, transform_indices = @transform_3, window_bounds = array<i64: 1, 175>}, {pipeline_mode = #tpu.pipeline_mode<synchronous>, transform_indices = @transform_4, window_bounds = array<i64: 175, 256>}, {pipeline_mode = #tpu.pipeline_mode<synchronous>, transform_indices = @transform_5, window_bounds = array<i64: 1, 256>}, {pipeline_mode = #tpu.pipeline_mode<synchronous>, transform_indices = @transform_6, window_bounds = array<i64: 256, 175>}, {pipeline_mode = #tpu.pipeline_mode<synchronous>, transform_indices = @transform_7, window_bounds = array<i64: 1, 175>}, {pipeline_mode = #tpu.pipeline_mode<synchronous>, transform_indices = @transform_8, window_bounds = array<i64: 1, 175>}, {pipeline_mode = #tpu.pipeline_mode<synchronous>, transform_indices = @transform_9, window_bounds = array<i64: 1, 175>}, {transform_indices = @transform_10, window_bounds = array<i64: 1, 8, 175>}, {transform_indices = @transform_11, window_bounds = array<i64: 1, 8, 8>}]} {
    %c0 = arith.constant 0 : index
    %c0_0 = arith.constant 0 : index
    %c0_1 = arith.constant 0 : index
    %0 = vector.load %arg1[%c0, %c0_0, %c0_1] : memref<1x8x175xf32, #tpu.memory_space<vmem>>, vector<1x8x175xf32>
    %1 = vector.shape_cast %0 : vector<1x8x175xf32> to vector<8x175xf32>
    %c0_2 = arith.constant 0 : index
    %c0_3 = arith.constant 0 : index
    %2 = vector.load %arg2[%c0_2, %c0_3] : memref<1x175xf32, #tpu.memory_space<vmem>>, vector<1x175xf32>
    %3 = vector.broadcast %2 : vector<1x175xf32> to vector<8x175xf32>
    %4 = arith.mulf %1, %3 : vector<8x175xf32>
    %5 = arith.truncf %4 : vector<8x175xf32> to vector<8x175xbf16>
    %cst = arith.constant dense<0.000000e+00> : vector<8x8xf32>
    %6 = tpu.matmul %5, %5, %cst {dimension_numbers = #tpu.dot_dimension_numbers<[1], [1], [0], [0], [0, 0, 1, 0], [], []>} : vector<8x175xbf16>, vector<8x175xbf16>, vector<8x8xf32> -> vector<8x8xf32>
    %cst_4 = arith.constant 7.559290e-02 : f32
    %7 = vector.broadcast %cst_4 : f32 to vector<8x8xf32>
    %8 = arith.mulf %6, %7 : vector<8x8xf32>
    %c0_5 = arith.constant 0 : index
    %c0_6 = arith.constant 0 : index
    %c0_7 = arith.constant 0 : index
    %9 = vector.load %arg12[%c0_5, %c0_6, %c0_7] : memref<1x8x8xf32, #tpu.memory_space<vmem>>, vector<1x8x8xf32>
    %10 = vector.shape_cast %9 : vector<1x8x8xf32> to vector<8x8xf32>
    %11 = vector.shape_cast %8 : vector<8x8xf32> to vector<1x8x8xf32>
    tpu.vector_store %arg12[%c0_5, %c0_6, %c0_7], %11 {strides = array<i32>} : memref<1x8x8xf32, #tpu.memory_space<vmem>>, vector<1x8x8xf32>,
    %cst_8 = arith.constant dense<0xFF800000> : vector<8xf32>
    %12 = vector.multi_reduction <maximumf>, %8, %cst_8 [1] : vector<8x8xf32> to vector<8xf32>
    %13 = vector.shape_cast %12 : vector<8xf32> to vector<8x1xf32>
    %14 = vector.broadcast %13 : vector<8x1xf32> to vector<8x8xf32>
    %15 = arith.subf %8, %14 : vector<8x8xf32>
    %16 = math.exp %15 : vector<8x8xf32>
    %cst_9 = arith.constant dense<0.000000e+00> : vector<8xf32>
    %17 = vector.multi_reduction <add>, %16, %cst_9 [1] : vector<8x8xf32> to vector<8xf32>
    %18 = vector.shape_cast %17 : vector<8xf32> to vector<8x1xf32>
    %19 = tpu.reciprocal %18 {approx = true} : vector<8x1xf32> -> vector<8x1xf32>
    %20 = vector.broadcast %19 : vector<8x1xf32> to vector<8x8xf32>
    %21 = arith.mulf %16, %20 : vector<8x8xf32>
    %22 = arith.truncf %21 : vector<8x8xf32> to vector<8x8xbf16>
    %cst_10 = arith.constant dense<0.000000e+00> : vector<8x175xf32>
    %23 = tpu.matmul %22, %5, %cst_10 {dimension_numbers = #tpu.dot_dimension_numbers<[1], [0], [0], [1], [0, 0, 1, 1], [], []>} : vector<8x8xbf16>, vector<8x175xbf16>, vector<8x175xf32> -> vector<8x175xf32>
    %24 = arith.addf %23, %1 : vector<8x175xf32>
    %c0_11 = arith.constant 0 : index
    %c0_12 = arith.constant 0 : index
    %25 = vector.load %arg3[%c0_11, %c0_12] : memref<1x175xf32, #tpu.memory_space<vmem>>, vector<1x175xf32>
    %c0_13 = arith.constant 0 : index
    %c0_14 = arith.constant 0 : index
    %26 = vector.load %arg4[%c0_13, %c0_14] : memref<1x175xf32, #tpu.memory_space<vmem>>, vector<1x175xf32>
    %cst_15 = arith.constant dense<0.000000e+00> : vector<8xf32>
    %27 = vector.multi_reduction <add>, %24, %cst_15 [1] : vector<8x175xf32> to vector<8xf32>
    %28 = vector.shape_cast %27 : vector<8xf32> to vector<8x1xf32>
    %cst_16 = arith.constant 1.750000e+02 : f32
    %29 = vector.broadcast %cst_16 : f32 to vector<8x1xf32>
    %30 = arith.divf %28, %29 : vector<8x1xf32>
    %31 = vector.broadcast %30 : vector<8x1xf32> to vector<8x175xf32>
    %32 = arith.subf %24, %31 : vector<8x175xf32>
    %33 = arith.mulf %32, %32 : vector<8x175xf32>
    %cst_17 = arith.constant dense<0.000000e+00> : vector<8xf32>
    %34 = vector.multi_reduction <add>, %33, %cst_17 [1] : vector<8x175xf32> to vector<8xf32>
    %35 = vector.shape_cast %34 : vector<8xf32> to vector<8x1xf32>
    %cst_18 = arith.constant 1.750000e+02 : f32
    %36 = vector.broadcast %cst_18 : f32 to vector<8x1xf32>
    %37 = arith.divf %35, %36 : vector<8x1xf32>
    %cst_19 = arith.constant 9.99999974E-6 : f32
    %38 = vector.broadcast %cst_19 : f32 to vector<8x1xf32>
    %39 = arith.addf %37, %38 : vector<8x1xf32>
    %40 = math.rsqrt %39 : vector<8x1xf32>
    %41 = vector.broadcast %40 : vector<8x1xf32> to vector<8x175xf32>
    %42 = arith.mulf %32, %41 : vector<8x175xf32>
    %43 = vector.broadcast %25 : vector<1x175xf32> to vector<8x175xf32>
    %44 = arith.mulf %42, %43 : vector<8x175xf32>
    %45 = vector.broadcast %26 : vector<1x175xf32> to vector<8x175xf32>
    %46 = arith.addf %44, %45 : vector<8x175xf32>
    %47 = arith.truncf %46 : vector<8x175xf32> to vector<8x175xbf16>
    %c0_20 = arith.constant 0 : index
    %c0_21 = arith.constant 0 : index
    %48 = vector.load %arg5[%c0_20, %c0_21] : memref<175x256xbf16, #tpu.memory_space<vmem>>, vector<175x256xbf16>
    %cst_22 = arith.constant dense<0.000000e+00> : vector<8x256xf32>
    %49 = tpu.matmul %47, %48, %cst_22 {dimension_numbers = #tpu.dot_dimension_numbers<[1], [0], [0], [1], [0, 0, 1, 1], [], []>} : vector<8x175xbf16>, vector<175x256xbf16>, vector<8x256xf32> -> vector<8x256xf32>
    %c0_23 = arith.constant 0 : index
    %c0_24 = arith.constant 0 : index
    %50 = vector.load %arg6[%c0_23, %c0_24] : memref<1x256xf32, #tpu.memory_space<vmem>>, vector<1x256xf32>
    %51 = vector.broadcast %50 : vector<1x256xf32> to vector<8x256xf32>
    %52 = arith.addf %49, %51 : vector<8x256xf32>
    %cst_25 = arith.constant 0.000000e+00 : f32
    %53 = vector.broadcast %cst_25 : f32 to vector<8x256xf32>
    %54 = arith.maximumf %52, %53 : vector<8x256xf32>
    %55 = arith.truncf %54 : vector<8x256xf32> to vector<8x256xbf16>
    %c0_26 = arith.constant 0 : index
    %c0_27 = arith.constant 0 : index
    %56 = vector.load %arg7[%c0_26, %c0_27] : memref<256x175xbf16, #tpu.memory_space<vmem>>, vector<256x175xbf16>
    %cst_28 = arith.constant dense<0.000000e+00> : vector<8x175xf32>
    %57 = tpu.matmul %55, %56, %cst_28 {dimension_numbers = #tpu.dot_dimension_numbers<[1], [0], [0], [1], [0, 0, 1, 1], [], []>} : vector<8x256xbf16>, vector<256x175xbf16>, vector<8x175xf32> -> vector<8x175xf32>
    %c0_29 = arith.constant 0 : index
    %c0_30 = arith.constant 0 : index
    %58 = vector.load %arg8[%c0_29, %c0_30] : memref<1x175xf32, #tpu.memory_space<vmem>>, vector<1x175xf32>
    %59 = vector.broadcast %58 : vector<1x175xf32> to vector<8x175xf32>
    %60 = arith.addf %57, %59 : vector<8x175xf32>
    %61 = arith.addf %60, %46 : vector<8x175xf32>
    %c0_31 = arith.constant 0 : index
    %c0_32 = arith.constant 0 : index
    %62 = vector.load %arg9[%c0_31, %c0_32] : memref<1x175xf32, #tpu.memory_space<vmem>>, vector<1x175xf32>
    %c0_33 = arith.constant 0 : index
    %c0_34 = arith.constant 0 : index
    %63 = vector.load %arg10[%c0_33, %c0_34] : memref<1x175xf32, #tpu.memory_space<vmem>>, vector<1x175xf32>
    %cst_35 = arith.constant dense<0.000000e+00> : vector<8xf32>
    %64 = vector.multi_reduction <add>, %61, %cst_35 [1] : vector<8x175xf32> to vector<8xf32>
    %65 = vector.shape_cast %64 : vector<8xf32> to vector<8x1xf32>
    %cst_36 = arith.constant 1.750000e+02 : f32
    %66 = vector.broadcast %cst_36 : f32 to vector<8x1xf32>
    %67 = arith.divf %65, %66 : vector<8x1xf32>
    %68 = vector.broadcast %67 : vector<8x1xf32> to vector<8x175xf32>
    %69 = arith.subf %61, %68 : vector<8x175xf32>
    %70 = arith.mulf %69, %69 : vector<8x175xf32>
    %cst_37 = arith.constant dense<0.000000e+00> : vector<8xf32>
    %71 = vector.multi_reduction <add>, %70, %cst_37 [1] : vector<8x175xf32> to vector<8xf32>
    %72 = vector.shape_cast %71 : vector<8xf32> to vector<8x1xf32>
    %cst_38 = arith.constant 1.750000e+02 : f32
    %73 = vector.broadcast %cst_38 : f32 to vector<8x1xf32>
    %74 = arith.divf %72, %73 : vector<8x1xf32>
    %cst_39 = arith.constant 9.99999974E-6 : f32
    %75 = vector.broadcast %cst_39 : f32 to vector<8x1xf32>
    %76 = arith.addf %74, %75 : vector<8x1xf32>
    %77 = math.rsqrt %76 : vector<8x1xf32>
    %78 = vector.broadcast %77 : vector<8x1xf32> to vector<8x175xf32>
    %79 = arith.mulf %69, %78 : vector<8x175xf32>
    %80 = vector.broadcast %62 : vector<1x175xf32> to vector<8x175xf32>
    %81 = arith.mulf %79, %80 : vector<8x175xf32>
    %82 = vector.broadcast %63 : vector<1x175xf32> to vector<8x175xf32>
    %83 = arith.addf %81, %82 : vector<8x175xf32>
    %c0_40 = arith.constant 0 : index
    %c0_41 = arith.constant 0 : index
    %c0_42 = arith.constant 0 : index
    %84 = vector.load %arg11[%c0_40, %c0_41, %c0_42] : memref<1x8x175xf32, #tpu.memory_space<vmem>>, vector<1x8x175xf32>
    %85 = vector.shape_cast %84 : vector<1x8x175xf32> to vector<8x175xf32>
    %86 = vector.shape_cast %83 : vector<8x175xf32> to vector<1x8x175xf32>
    tpu.vector_store %arg11[%c0_40, %c0_41, %c0_42], %86 {strides = array<i32>} : memref<1x8x175xf32, #tpu.memory_space<vmem>>, vector<1x8x175xf32>,
    return
  }
  func.func @transform_0(%arg0: i32) -> (i32, i32, i32) {
    %c0_i32 = arith.constant 0 : i32
    %c0_i32_0 = arith.constant 0 : i32
    %c0_i32_1 = arith.constant 0 : i32
    return %arg0, %c0_i32, %c0_i32_0 : i32, i32, i32
  }
  func.func @transform_1(%arg0: i32) -> (i32, i32) {
    %c0_i32 = arith.constant 0 : i32
    %c0_i32_0 = arith.constant 0 : i32
    %c0_i32_1 = arith.constant 0 : i32
    return %c0_i32, %c0_i32_0 : i32, i32
  }
  func.func @transform_2(%arg0: i32) -> (i32, i32) {
    %c0_i32 = arith.constant 0 : i32
    %c0_i32_0 = arith.constant 0 : i32
    %c0_i32_1 = arith.constant 0 : i32
    return %c0_i32, %c0_i32_0 : i32, i32
  }
  func.func @transform_3(%arg0: i32) -> (i32, i32) {
    %c0_i32 = arith.constant 0 : i32
    %c0_i32_0 = arith.constant 0 : i32
    %c0_i32_1 = arith.constant 0 : i32
    return %c0_i32, %c0_i32_0 : i32, i32
  }
  func.func @transform_4(%arg0: i32) -> (i32, i32) {
    %c0_i32 = arith.constant 0 : i32
    %c0_i32_0 = arith.constant 0 : i32
    %c0_i32_1 = arith.constant 0 : i32
    return %c0_i32, %c0_i32_0 : i32, i32
  }
  func.func @transform_5(%arg0: i32) -> (i32, i32) {
    %c0_i32 = arith.constant 0 : i32
    %c0_i32_0 = arith.constant 0 : i32
    %c0_i32_1 = arith.constant 0 : i32
    return %c0_i32, %c0_i32_0 : i32, i32
  }
  func.func @transform_6(%arg0: i32) -> (i32, i32) {
    %c0_i32 = arith.constant 0 : i32
    %c0_i32_0 = arith.constant 0 : i32
    %c0_i32_1 = arith.constant 0 : i32
    return %c0_i32, %c0_i32_0 : i32, i32
  }
  func.func @transform_7(%arg0: i32) -> (i32, i32) {
    %c0_i32 = arith.constant 0 : i32
    %c0_i32_0 = arith.constant 0 : i32
    %c0_i32_1 = arith.constant 0 : i32
    return %c0_i32, %c0_i32_0 : i32, i32
  }
  func.func @transform_8(%arg0: i32) -> (i32, i32) {
    %c0_i32 = arith.constant 0 : i32
    %c0_i32_0 = arith.constant 0 : i32
    %c0_i32_1 = arith.constant 0 : i32
    return %c0_i32, %c0_i32_0 : i32, i32
  }
  func.func @transform_9(%arg0: i32) -> (i32, i32) {
    %c0_i32 = arith.constant 0 : i32
    %c0_i32_0 = arith.constant 0 : i32
    %c0_i32_1 = arith.constant 0 : i32
    return %c0_i32, %c0_i32_0 : i32, i32
  }
  func.func @transform_10(%arg0: i32) -> (i32, i32, i32) {
    %c0_i32 = arith.constant 0 : i32
    %c0_i32_0 = arith.constant 0 : i32
    %c0_i32_1 = arith.constant 0 : i32
    return %arg0, %c0_i32, %c0_i32_0 : i32, i32, i32
  }
  func.func @transform_11(%arg0: i32) -> (i32, i32, i32) {
    %c0_i32 = arith.constant 0 : i32
    %c0_i32_0 = arith.constant 0 : i32
    %c0_i32_1 = arith.constant 0 : i32
    return %arg0, %c0_i32, %c0_i32_0 : i32, i32, i32
  }
}

</mosaic_0001>

<bundles_post_ra>
// kernel: tpu_custom_call.1
= control target key start
LH: loop header
LB: loop body
LE: loop exit
PB: predicated region body
PF: predicated region fallthrough
CT: control target
= control target key end

     0   :  { %s2176_s0 = inlined_call_operand.vmem [shape: f32[2,8,175], index: 0, kind: input, shape index: {}]   ;;  %s2177_s1 = inlined_call_operand.vmem [shape: f32[1,175], index: 1, kind: input, shape index: {}]   ;;  %s2178_s2 = inlined_call_operand.vmem [shape: f32[1,175], index: 2, kind: input, shape index: {}]   ;;  %s2179_s3 = inlined_call_operand.vmem [shape: f32[1,175], index: 3, kind: input, shape index: {}]   ;;  %s2180_s4 = inlined_call_operand.vmem [shape: bf16[175,256], index: 4, kind: input, shape index: {}]   ;;  %s2181_s5 = inlined_call_operand.vmem [shape: f32[1,256], index: 5, kind: input, shape index: {}]   ;;  %s2182_s6 = inlined_call_operand.vmem [shape: bf16[256,175], index: 6, kind: input, shape index: {}]   ;;  %s2183_s7 = inlined_call_operand.vmem [shape: f32[1,175], index: 7, kind: input, shape index: {}]   ;;  %s2184_s8 = inlined_call_operand.vmem [shape: f32[1,175], index: 8, kind: input, shape index: {}]   ;;  %s2185_s9 = inlined_call_operand.vmem [shape: f32[1,175], index: 9, kind: input, shape index: {}]   ;;  %s2186_s10 = inlined_call_operand.hbm [shape: f32[2,8,175], index: 10, kind: output, shape index: {0}]   ;;  %s2187_s11 = inlined_call_operand.hbm [shape: f32[2,8,8], index: 11, kind: output, shape index: {1}]  }
   0x1   :  { %2188 = sst [smem:[#allocation9_spill]] %s2176_s0 }
   0x2   :  { %2189 = sst [smem:[#allocation10_spill]] %s2177_s1 }
   0x3   :  { %2190 = sst [smem:[#allocation11_spill]] %s2178_s2 }
   0x4   :  { %2191 = sst [smem:[#allocation12_spill]] %s2179_s3 }
   0x5   :  { %2192 = sst [smem:[#allocation13_spill]] %s2180_s4 }
   0x6   :  { %17 = vsyncpa [#allocation3], 0 }
   0x7   :  { %19 = vsyncpa [#allocation3 + $0x1], 0 }
   0x8   :  { %20 = vsyncpa [#allocation5], 0 }
   0x9   :  { %22 = vsyncpa [#allocation5 + $0x1], 0  ;;  %s1677_s17 = smov 0   ;;  %s1679_s18 = smov 0  }
   0xa   :  { %s1681_s19 = smov 0   ;;  %s1683_s20 = smov 0  }
   0xb LB: > { %s1698_s21 = sadd.s32 4294967295, %s1613_s20   ;;  %s1171_s22 = sadd.s32 4294967294, %s1613_s20   ;;  %s1613_s20 = sphi %s1683_s20, %s2205_s20   ;;  %s1609_s19 = sphi %s1681_s19, %s2204_s19   ;;  %s1605_s18 = sphi %s1679_s18, %s2203_s18   ;;  %s1601_s17 = sphi %s1677_s17, %s2202_s17  }
   0xc   : > { %s1702_s23 = sadd.s32 1, %s1613_s20   ;;  %s250_s24 = sadd.s32 1, %s1609_s19 }
   0xd   : > { %s247_s25 = ssub.s32 %s1613_s20, %s1702_s23  ;;  %p260_p0 = scmp.ne.s32.totalorder %s1609_s19, %s1605_s18 }
   0xe   : > { %p248_p1 = scmp.eq.s32.totalorder %s247_s25, 0  ;;  %p261_p2 = scmp.eq.s32.totalorder %s1698_s21, 1 }
   0xf   : > { %p266_p3 = scmp.ne.s32.totalorder %s1605_s18, %s1601_s17  ;;  %p267_p4 = scmp.eq.s32.totalorder %s1171_s22, 1 }
  0x10   : > { %s1713_s26 = scalar_select %p248_p1, %s1609_s19, %s250_s24  }
  0x11   : > { %p1715_p5 = por %p261_p2, %p260_p0  ;;  %p1719_p6 = por %p267_p4, %p266_p3 }
  0x12   : > { %2193 = sst [smem:[#allocation8_spill]] %s1713_s26  ;;  %p1174_p7 = scmp.ge.s32.totalorder %s1613_s20, 1 }
  0x13   : > { %p346_p8 = scmp.lt.s32.totalorder %s1613_s20, 3 }
  0x15   : > { %p347_p9 = pnand %p1174_p7, %p346_p8 }
  0x16   : > { %p391_p10 = scmp.lt.s32.totalorder (!%p347_p9), %s1698_s21, 1  ;;  %s2196_s1 = sld [smem:[#allocation10_spill]] (!%p347_p9) }
  0x17   : > { %350 = sbr.rel (%p347_p9) target bundleno = 1393 (0x571), region = 60  ;;  %s2197_s0 = sld [smem:[#allocation9_spill]] (!%p347_p9) }
  0x18   : > { %s1736_s22 = sand.u32 (!%p347_p9), 1, %s1605_s18   ;;  %s2198_s4 = sld [smem:[#allocation13_spill]] (!%p347_p9) }
  0x19   : > { %s1176_s24 = sshll.u32 (!%p347_p9), %s1736_s22, 3  ;;  %s2199_s2 = sld [smem:[#allocation11_spill]] (!%p347_p9) }
  0x1a   : > { %s1740_s25 = scalar_lea.vmem (!%p347_p9), [#allocation4], %s1176_s24  ;;  %s2200_s3 = sld [smem:[#allocation12_spill]] (!%p347_p9) }
  0x1b   : > { %s1404_s14 = sshll.u32 (!%p347_p9), %s1698_s21, 3  ;;  %s1076_s24 = sshll.u32 (!%p347_p9), %s1740_s25, 4  ;;  %s1077_s24 = int_to_ptr.vmem [resolvable:$true] %s1076_s24 }
  0x1c   : > { %v399_v0 = vld [vmem:[%s2196_s1] sm:$0x3]  ;;  %s392_s12 = scalar_select %p391_p10, %s1698_s21, 1  ;;  %vm409_vm0 = vcmask 384000   ;;  %vm440_vm1 = vcmask 64512   ;;  %vm457_vm2 = vcmask 1043456  }
  0x1d   : > { %v401_v1 = vperm.slane %v399_v0, 0  ;;  %v402_v2 = vperm.slane %v399_v0, 1  ;;  %v1615_v36 = vmov 175.0   ;;  %vm680_vm4 = vcmask 1046528   ;;  %s1074_s26 = scalar_lea.hbm %s2187_s11, %s1404_s14  ;;  %s1049_s1 = scalar_lea.sflag [#allocation5], %s1736_s22 }
  0x1e   : > { %s1407_s13 = sshll.u32 %s392_s12, 4  ;;  %v1240_v37 = vld [vmem:[%s2198_s4 + $0x70] sm:$0xf]  ;;  %v1423_v38 = vld [vmem:[%s2198_s4 + $0x74] sm:$0xf0]  ;;  %vm681_vm5 = vcmask 1047552  }
  0x1f   : > { %s395_s16 = scalar_lea.vmem %s2197_s0, %s1407_s13  ;;  %v1422_v39 = vld [vmem:[%s2198_s4 + $0x74] sm:$0xf]  ;;  %v1241_v41 = vor.u32 %v1423_v38, %v1240_v37  ;;  %v1242_v42 = vld [vmem:[%s2198_s4 + $0x78] sm:$0xf0]  ;;  %v1232_v57 = vld [vmem:[%s2198_s4 + $0x60] sm:$0xf] }
  0x20   : > { %v397_v3 = vld [vmem:[%s395_s16] sm:$0xff]  ;;  %v398_v4 = vld [vmem:[%s395_s16 + $0x8] sm:$0xff]  ;;  %v1245_v43 = vor.u32 %v1422_v39, %v1242_v42  ;;  %v1224_v63 = vld [vmem:[%s2198_s4 + $0x50] sm:$0xf]  ;;  %s1078_s0 = sshll.u32 %s1074_s26, 4  ;;  %s1539_s13 = scalar_lea.hbm %s2187_s11, 16  ;;  %s1079_s0 = int_to_ptr.hbm [resolvable:$true] %s1078_s0 }
  0x21   : > { %v405_v5 = vmul.f32 %v401_v1, %v397_v3  ;;  %v406_v6 = vmul.f32 %v402_v2, %v398_v4  ;;  %v1421_v58 = vld [vmem:[%s2198_s4 + $0x64] sm:$0xf0]  ;;  %v1420_v59 = vld [vmem:[%s2198_s4 + $0x64] sm:$0xf]  ;;  %v1234_v61 = vld [vmem:[%s2198_s4 + $0x68] sm:$0xf0] }
  0x22   : > { %v1233_v60 = vor.u32 %v1421_v58, %v1232_v57  ;;  %v1237_v62 = vor.u32 %v1420_v59, %v1234_v61  ;;  %v1419_v0 = vld [vmem:[%s2198_s4 + $0x54] sm:$0xf0]  ;;  %v1418_v1 = vld [vmem:[%s2198_s4 + $0x54] sm:$0xf]  ;;  %v1424_v57 = vld [vmem:[%s2198_s4 + $0x84] sm:$0xf] }
  0x23   : > { %v407_v7 = vpack.c.bf16 %v405_v5, %v405_v5  ;;  %v408_v8 = vpack.c.bf16 %v406_v6, %v406_v6  ;;  %v1225_v2 = vor.u32 %v1419_v0, %v1224_v63  ;;  %v1216_v5 = vld [vmem:[%s2198_s4 + $0x40] sm:$0xf]  ;;  %v1417_v6 = vld [vmem:[%s2198_s4 + $0x44] sm:$0xf0]  ;;  %v1411_v38 = vld [vmem:[%s2198_s4 + $0x14] sm:$0xf0] }
  0x24   : > { %v1410_v39 = vld [vmem:[%s2198_s4 + $0x14] sm:$0xf]  ;;  %v1250_v59 = vld [vmem:[%s2198_s4 + $0x88] sm:$0xf0]  ;;  %v1461_v63 = vld [vmem:[%s2182_s6 + $0xf4] sm:$0xf0] }
  0x25   : > { %420 = vmatpush.bf16.xpose.msra.mxu0 %v407_v7  ;;  %v411_v9 = vsel %vm409_vm0, %v408_v8, 0  ;;  %v459_v22 = vsel %vm457_vm2, %v407_v7, 0  ;;  %v461_v23 = vsel %vm457_vm2, %v408_v8, 0  ;;  %v1460_v0 = vld [vmem:[%s2182_s6 + $0xf4] sm:$0xf]  ;;  %s1533_s29 = sshra.s32 %s1079_s0, 4  ;;  %s1534_s29 = int_to_ptr.hbm [resolvable:$true] %s1533_s29 }
  0x26   : > { %433 = vmatpush.bf16.xpose.msra.mxu1 %v411_v9  ;;  %470 = vmatpush.bf16.msra.mxu2 %v459_v22  ;;  %v1218_v9 = vld [vmem:[%s2198_s4 + $0x48] sm:$0xf0]  ;;  %v1428_v22 = vld [vmem:[%s2198_s4 + $0xa4] sm:$0xf]  ;;  %s1535_s30 = scalar_lea.hbm %s1534_s29, 8  ;;  %p1540_p0 = scmp.lt.s32.totalorder %s1534_s29, %s2187_s11 }
  0x27   : > { %483 = vmatpush.bf16.msra.mxu3 %v461_v23  ;;  %v1266_v23 = vld [vmem:[%s2198_s4 + $0xa8] sm:$0xf0]  ;;  %p1536_p11 = scmp.ne.s32.totalorder %s1534_s29, %s1535_s30  ;;  %p1541_p1 = scmp.lt.s32.totalorder %s1539_s13, %s1535_s30 }
  0x29   : > { %p1537_p12 = pnand %p1536_p11, %p1715_p5  ;;  %p1542_p2 = por %p1541_p1, %p1540_p0 }
  0x2a   : > { %690 = vmatpush.bf16.msrb.mxu2 %v1241_v41 }
  0x2b   : > { %p1538_p13 = pneg %p1537_p12 }
  0x2c   : > { %421 = vmatmul.bf16.vlgmr.msra.gmra.mxu0 %v407_v7  ;;  %v1416_v7 = vld [vmem:[%s2198_s4 + $0x44] sm:$0xf] }
  0x2d   : > { %1179 = vmatmul.msk.bf16.vlgmr.msra.gmra.mxu1 %vm409_vm0, %v408_v8  ;;  %716 = vmatpush.bf16.msrb.mxu0 %v1245_v43  ;;  %v1217_v8 = vor.u32 %v1417_v6, %v1216_v5  ;;  %v1426_v43 = vld [vmem:[%s2198_s4 + $0x94] sm:$0xf]  ;;  %v1459_v5 = vld [vmem:[%s2182_s6 + $0xe4] sm:$0xf0]  ;;  %p1543_p3 = pnand %p1542_p2, %p1538_p13 }
  0x2e   : > { %691 = vmatpush.bf16.msrb.mxu2 %v1233_v60  ;;  %v1253_v60 = vor.u32 %v1424_v57, %v1250_v59 }
  0x31   : > { %717 = vmatpush.bf16.msrb.mxu0 %v1237_v62  ;;  %v1394_v62 = vld [vmem:[%s2182_s6 + $0xf0] sm:$0xf] }
  0x32   : > { %692 = vmatpush.bf16.msrb.mxu2 %v1225_v2  ;;  %v1395_v2 = vor.u32 %v1461_v63, %v1394_v62  ;;  %v1451_v62 = vld [vmem:[%s2182_s6 + $0xa4] sm:$0xf0]  ;;  %v1450_v63 = vld [vmem:[%s2182_s6 + $0xa4] sm:$0xf] }
  0x36   : > { %693 = vmatpush.bf16.msrb.mxu2 %v1217_v8  ;;  %v1388_v8 = vld [vmem:[%s2182_s6 + $0xe8] sm:$0xf0] }
  0xa9   : > { %v422_v10 = vpop.f32.mrf.mxu0 }
  0xaa   : > { %v435_v11 = vpop.f32.mrf.mxu1 }
  0xab   : > { %v436_v12 = vadd.f32 %v435_v11, %v422_v10  ;;  %v1221_v10 = vor.u32 %v1416_v7, %v1218_v9  ;;  %v1208_v11 = vld [vmem:[%s2198_s4 + $0x30] sm:$0xf]  ;;  %v1458_v7 = vld [vmem:[%s2182_s6 + $0xe4] sm:$0xf] }
  0xac   : > { %v1330_v9 = vld [vmem:[%s2182_s6 + $0x70] sm:$0xf] }
  0xad   : > { %v439_v13 = vmul.f32 0.0755929, %v436_v12  ;;  %v1415_v12 = vld [vmem:[%s2198_s4 + $0x34] sm:$0xf0] }
  0xaf   : > { %v442_v14 = vsel %vm440_vm1, %v439_v13, -inf  ;;  %441 = vst.msk [vmem:[%s1740_s25] sm:$0xff] %vm440_vm1, %v439_v13 }
  0xb0   : > { %443 = vmax.xlane.f32.xlu0 %v442_v14  ;;  %v1209_v14 = vor.u32 %v1415_v12, %v1208_v11  ;;  %v1445_v12 = vld [vmem:[%s2182_s6 + $0x74] sm:$0xf0] }
  0xb1   : > { %v424_v15 = vpop.f32.mrf.mxu0 }
  0xb2   : > { %v437_v16 = vpop.f32.mrf.mxu1  ;;  %v1210_v15 = vld [vmem:[%s2198_s4 + $0x38] sm:$0xf0]  ;;  %694 = vmatpush.bf16.msrb.mxu2 %v1209_v14  ;;  %v1391_v14 = vor.u32 %v1458_v7, %v1388_v8 }
 0x123   : > { %v444_v17 = vpop.xlane.xlu0 %443 }
 0x124   : > { %v445_v18 = vsub.f32 %v439_v13, %v444_v17  ;;  %v1414_v13 = vld [vmem:[%s2198_s4 + $0x34] sm:$0xf]  ;;  %v1264_v17 = vld [vmem:[%s2198_s4 + $0xa0] sm:$0xf] }
 0x125   : > { %v1213_v16 = vor.u32 %v1414_v13, %v1210_v15  ;;  %v1444_v13 = vld [vmem:[%s2182_s6 + $0x74] sm:$0xf]  ;;  %v1331_v15 = vor.u32 %v1445_v12, %v1330_v9 }
 0x126   : > { %v446_v19 = vmul.f32 1.442695, %v445_v18  ;;  %v1429_v18 = vld [vmem:[%s2198_s4 + $0xa4] sm:$0xf0] }
 0x128   : > { %1509 = vpow2.f32 %v446_v19  ;;  %v1265_v19 = vor.u32 %v1429_v18, %v1264_v17  ;;  %v1378_v17 = vld [vmem:[%s2182_s6 + $0xd0] sm:$0xf]  ;;  %v1457_v18 = vld [vmem:[%s2182_s6 + $0xd4] sm:$0xf0] }
 0x12e   : > { %v1510_v20 = vpop.eup %1509 }
 0x12f   : > { %v448_v21 = vsel %vm440_vm1, %v1510_v20, 0.0 }
 0x130   : > { %449 = vadd.xlane.f32.xlu0 %v448_v21 }
 0x1a3   : > { %v450_v24 = vpop.xlane.xlu0 %449 }
 0x1a4   : > { %1511 = vrcp.f32 %v450_v24 }
 0x1a5   : > { %1513 = vrcp.f32 %v1615_v36  ;;  %v1192_v36 = vld [vmem:[%s2198_s4 + $0x10] sm:$0xf] }
 0x1a6   : > { %v1193_v41 = vor.u32 %v1411_v38, %v1192_v36  ;;  %v1440_v36 = vld [vmem:[%s2182_s6 + $0x54] sm:$0xf] }
 0x1aa   : > { %v1512_v25 = vpop.eup %1511 }
 0x1ab   : > { %v452_v26 = vmul.f32 %v1512_v25, %v1510_v20  ;;  %v1514_v40 = vpop.eup %1513  ;;  %v1616_v20 = vmov 65535   ;;  %v1200_v25 = vld [vmem:[%s2198_s4 + $0x20] sm:$0xf] }
 0x1ac   : > { %v496_v44 = vmul.f32 175.0, %v1514_v40  ;;  %vm500_vm3 = vweird.f32 %v1514_v40  ;;  %v682_v21 = vsel %vm680_vm4, 4294967295, %v1616_v20  ;;  %v1456_v20 = vld [vmem:[%s2182_s6 + $0xd4] sm:$0xf] }
 0x1ad   : > { %v453_v27 = vpack.c.bf16 %v452_v26, %v452_v26  ;;  %v683_v24 = vsel %vm681_vm5, %v682_v21, 0  ;;  %v1413_v26 = vld [vmem:[%s2198_s4 + $0x24] sm:$0xf0]  ;;  %v1380_v21 = vld [vmem:[%s2182_s6 + $0xd8] sm:$0xf0] }
 0x1ae   : > { %v497_v45 = vsub.f32 1.0, %v496_v44  ;;  %v1258_v44 = vld [vmem:[%s2198_s4 + $0x98] sm:$0xf0] }
 0x1af   : > { %1180 = vmatmul.msk.bf16.vlgmr.msra.gmra.mxu2 %vm440_vm1, %v453_v27  ;;  %1181 = vmatmul.msk.bf16.vlgmr.msra.gmra.mxu3 %vm440_vm1, %v453_v27  ;;  %v1269_v27 = vor.u32 %v1428_v22, %v1266_v23  ;;  %v1322_v22 = vld [vmem:[%s2182_s6 + $0x60] sm:$0xf]  ;;  %v1443_v23 = vld [vmem:[%s2182_s6 + $0x64] sm:$0xf0] }
 0x1b0   : > { %v498_v46 = vmul.f32 %v1514_v40, %v497_v45  ;;  %v1184_v45 = vld [vmem:[%s2198_s4] sm:$0xf] }
 0x1b2   : > { %v499_v47 = vadd.f32 %v1514_v40, %v498_v46  ;;  %v1261_v46 = vor.u32 %v1426_v43, %v1258_v44  ;;  %v1306_v43 = vld [vmem:[%s2182_s6 + $0x40] sm:$0xf]  ;;  %v1439_v44 = vld [vmem:[%s2182_s6 + $0x44] sm:$0xf0] }
 0x1b4   : > { %v1760_v48 = vsel %vm500_vm3, %v1514_v40, %v499_v47  ;;  %v1194_v40 = vld [vmem:[%s2198_s4 + $0x18] sm:$0xf0]  ;;  %v1409_v47 = vld [vmem:[%s2198_s4 + $0x4] sm:$0xf0] }
 0x1b5   : > { %v1197_v42 = vor.u32 %v1410_v39, %v1194_v40 }
 0x232   : > { %v472_v28 = vpop.f32.mrf.mxu2  ;;  %v485_v29 = vpop.f32.mrf.mxu3 }
 0x233   : > { %v473_v30 = vadd.f32 %v472_v28, %v397_v3  ;;  %v486_v31 = vadd.f32 %v485_v29, %v398_v4  ;;  %v1226_v3 = vld [vmem:[%s2198_s4 + $0x58] sm:$0xf0]  ;;  %v685_v28 = vand.u32 %v1265_v19, %v683_v24  ;;  %v1201_v29 = vor.u32 %v1413_v26, %v1200_v25  ;;  %v1324_v25 = vld [vmem:[%s2182_s6 + $0x68] sm:$0xf0] }
 0x234   : > { %v1229_v4 = vor.u32 %v1418_v1, %v1226_v3  ;;  %v1396_v3 = vld [vmem:[%s2182_s6 + $0xf8] sm:$0xf0]  ;;  %v1379_v26 = vor.u32 %v1457_v18, %v1378_v17 }
 0x235   : > { %v491_v32 = vsel %vm409_vm0, %v486_v31, 0.0  ;;  %708 = vmatpush.bf16.msrb.mxu3 %v685_v28  ;;  %695 = vmatpush.bf16.msrb.mxu2 %v1201_v29  ;;  %v1399_v6 = vor.u32 %v1460_v0, %v1396_v3  ;;  %v1370_v29 = vld [vmem:[%s2182_s6 + $0xc0] sm:$0xf]  ;;  %v1356_v0 = vld [vmem:[%s2182_s6 + $0xa8] sm:$0xf0] }
 0x236   : > { %v492_v33 = vadd.f32 %v491_v32, %v473_v30  ;;  %718 = vmatpush.bf16.msrb.mxu0 %v1229_v4  ;;  %v1386_v4 = vld [vmem:[%s2182_s6 + $0xe0] sm:$0xf] }
 0x237   : > { %v1387_v11 = vor.u32 %v1459_v5, %v1386_v4  ;;  %v490_v5 = vld [vmem:[%s2200_s3] sm:$0x3] }
 0x238   : > { %493 = vadd.xlane.f32.xlu1 %v492_v33  ;;  %v688_v33 = vand.u32 %v1269_v27, %v683_v24  ;;  %v1442_v24 = vld [vmem:[%s2182_s6 + $0x64] sm:$0xf]  ;;  %v1323_v27 = vor.u32 %v1443_v23, %v1322_v22  ;;  %v1300_v22 = vld [vmem:[%s2182_s6 + $0x38] sm:$0xf0] }
 0x239   : > { %696 = vmatpush.bf16.msrb.mxu2 %v1193_v41  ;;  %v1327_v28 = vor.u32 %v1442_v24, %v1324_v25  ;;  %v1346_v24 = vld [vmem:[%s2182_s6 + $0x90] sm:$0xf]  ;;  %v1449_v25 = vld [vmem:[%s2182_s6 + $0x94] sm:$0xf0] }
 0x23a   : > { %v474_v34 = vpop.f32.mrf.mxu2  ;;  %v487_v35 = vpop.f32.mrf.mxu3  ;;  %719 = vmatpush.bf16.msrb.mxu0 %v1221_v10  ;;  %734 = vmatpush.bf16.msrb.mxu1 %v688_v33  ;;  %v1314_v33 = vld [vmem:[%s2182_s6 + $0x50] sm:$0xf] }
 0x23b   : > { %v1256_v34 = vld [vmem:[%s2198_s4 + $0x90] sm:$0xf]  ;;  %v1427_v35 = vld [vmem:[%s2198_s4 + $0x94] sm:$0xf0] }
 0x23c   : > { %v1257_v37 = vor.u32 %v1427_v35, %v1256_v34  ;;  %v1441_v34 = vld [vmem:[%s2182_s6 + $0x54] sm:$0xf0]  ;;  %v1372_v35 = vld [vmem:[%s2182_s6 + $0xc8] sm:$0xf0] }
 0x23d   : > { %v1315_v38 = vor.u32 %v1441_v34, %v1314_v33  ;;  %v1292_v34 = vld [vmem:[%s2182_s6 + $0x28] sm:$0xf0] }
 0x23e   : > { %720 = vmatpush.bf16.msrb.mxu0 %v1213_v16  ;;  %709 = vmatpush.bf16.msrb.mxu3 %v1257_v37  ;;  %v1332_v16 = vld [vmem:[%s2182_s6 + $0x78] sm:$0xf0] }
 0x23f   : > { %735 = vmatpush.bf16.msrb.mxu1 %v1261_v46  ;;  %v1335_v19 = vor.u32 %v1444_v13, %v1332_v16  ;;  %v1316_v37 = vld [vmem:[%s2182_s6 + $0x58] sm:$0xf0]  ;;  %v533_v13 = vperm.slane %v490_v5, 0 }
 0x240   : > { %v1319_v41 = vor.u32 %v1440_v36, %v1316_v37  ;;  %v1338_v36 = vld [vmem:[%s2182_s6 + $0x80] sm:$0xf]  ;;  %v1447_v37 = vld [vmem:[%s2182_s6 + $0x84] sm:$0xf0] }
 0x243   : > { %736 = vmatpush.bf16.msrb.mxu1 %v1253_v60 }
 0x247   : > { %957 = vmatpush.bf16.msra.mxu1 %v1395_v2  ;;  %v489_v2 = vld [vmem:[%s2199_s2] sm:$0x3] }
 0x248   : > { %v526_v7 = vperm.slane %v489_v2, 0  ;;  %v527_v8 = vperm.slane %v489_v2, 1 }
 0x24b   : > { %958 = vmatpush.bf16.msra.mxu1 %v1387_v11 }
 0x24f   : > { %959 = vmatpush.bf16.msra.mxu1 %v1379_v26  ;;  %v1448_v26 = vld [vmem:[%s2182_s6 + $0x94] sm:$0xf] }
 0x2ab   : > { %v494_v49 = vpop.xlane.xlu1 %493 }
 0x2ac   : > { %v502_v50 = vmul.f32 %v1760_v48, %v494_v49  ;;  %v1248_v49 = vld [vmem:[%s2198_s4 + $0x80] sm:$0xf] }
 0x2ae   : > { %v1763_v51 = vsub.f32 %v473_v30, %v502_v50  ;;  %v1765_v52 = vsub.f32 %v486_v31, %v502_v50  ;;  %v1412_v30 = vld [vmem:[%s2198_s4 + $0x24] sm:$0xf]  ;;  %v1202_v31 = vld [vmem:[%s2198_s4 + $0x28] sm:$0xf0]  ;;  %v1425_v50 = vld [vmem:[%s2198_s4 + $0x84] sm:$0xf0] }
 0x2af   : > { %v1205_v32 = vor.u32 %v1412_v30, %v1202_v31  ;;  %v1455_v30 = vld [vmem:[%s2182_s6 + $0xc4] sm:$0xf0]  ;;  %v1383_v31 = vor.u32 %v1456_v20, %v1380_v21  ;;  %v1436_v20 = vld [vmem:[%s2182_s6 + $0x34] sm:$0xf] }
 0x2b0   : > { %v505_v53 = vmul.f32 %v1763_v51, %v1763_v51  ;;  %v506_v54 = vmul.f32 %v1765_v52, %v1765_v52  ;;  %v1371_v40 = vor.u32 %v1455_v30, %v1370_v29  ;;  %v1303_v23 = vor.u32 %v1436_v20, %v1300_v22  ;;  %v1290_v30 = vld [vmem:[%s2182_s6 + $0x20] sm:$0xf] }
 0x2b1   : > { %721 = vmatpush.bf16.msrb.mxu0 %v1205_v32  ;;  %v1454_v32 = vld [vmem:[%s2182_s6 + $0xc4] sm:$0xf] }
 0x2b2   : > { %v507_v55 = vsel %vm409_vm0, %v506_v54, 0.0  ;;  %v1249_v54 = vor.u32 %v1425_v50, %v1248_v49  ;;  %v1375_v46 = vor.u32 %v1454_v32, %v1372_v35  ;;  %v1438_v49 = vld [vmem:[%s2182_s6 + $0x44] sm:$0xf]  ;;  %v1308_v50 = vld [vmem:[%s2182_s6 + $0x48] sm:$0xf0]  ;;  %960 = vmatpush.bf16.msra.mxu1 %v1371_v40 }
 0x2b3   : > { %v508_v56 = vadd.f32 %v507_v55, %v505_v53  ;;  %v1185_v53 = vor.u32 %v1409_v47, %v1184_v45  ;;  %v1408_v55 = vld [vmem:[%s2198_s4 + $0x4] sm:$0xf]  ;;  %v1453_v47 = vld [vmem:[%s2182_s6 + $0xb4] sm:$0xf0]  ;;  %v1340_v40 = vld [vmem:[%s2182_s6 + $0x88] sm:$0xf0] }
 0x2b4   : > { %710 = vmatpush.bf16.msrb.mxu3 %v1249_v54  ;;  %v1364_v54 = vld [vmem:[%s2182_s6 + $0xb8] sm:$0xf0]  ;;  %v1434_v32 = vld [vmem:[%s2182_s6 + $0x24] sm:$0xf] }
 0x2b5   : > { %509 = vadd.xlane.f32.xlu1 %v508_v56  ;;  %722 = vmatpush.bf16.msrb.mxu0 %v1197_v42  ;;  %v1186_v56 = vld [vmem:[%s2198_s4 + $0x8] sm:$0xf0]  ;;  %v1362_v42 = vld [vmem:[%s2182_s6 + $0xb0] sm:$0xf]  ;;  %v1295_v35 = vor.u32 %v1434_v32, %v1292_v34 }
 0x2b6   : > { %v1189_v58 = vor.u32 %v1408_v55, %v1186_v56  ;;  %697 = vmatpush.bf16.msrb.mxu2 %v1185_v53  ;;  %v1452_v53 = vld [vmem:[%s2182_s6 + $0xb4] sm:$0xf]  ;;  %v1307_v56 = vor.u32 %v1439_v44, %v1306_v43  ;;  %v1363_v57 = vor.u32 %v1453_v47, %v1362_v42  ;;  %v1282_v42 = vld [vmem:[%s2182_s6 + $0x10] sm:$0xf]  ;;  %v1433_v43 = vld [vmem:[%s2182_s6 + $0x14] sm:$0xf0] }
 0x2b7   : > { %v1367_v60 = vor.u32 %v1452_v53, %v1364_v54  ;;  %v1283_v44 = vor.u32 %v1433_v43, %v1282_v42  ;;  %v1430_v53 = vld [vmem:[%s2182_s6 + $0x4] sm:$0xf] }
 0x2b8   : > { %944 = vmatpush.bf16.msra.mxu3 %v1331_v15  ;;  %961 = vmatpush.bf16.msra.mxu1 %v1363_v57  ;;  %v563_v57 = vld [vmem:[%s2181_s5] sm:$0x3] }
 0x2b9   : > { %723 = vmatpush.bf16.msrb.mxu0 %v1189_v58  ;;  %v1311_v58 = vor.u32 %v1438_v49, %v1308_v50  ;;  %v1274_v49 = vld [vmem:[%s2182_s6] sm:$0xf]  ;;  %v1431_v50 = vld [vmem:[%s2182_s6 + $0x4] sm:$0xf0] }
 0x2ba   : > { %970 = vmatpush.bf16.msra.mxu2 %v1335_v19  ;;  %v1275_v54 = vor.u32 %v1431_v50, %v1274_v49 }
 0x2bc   : > { %945 = vmatpush.bf16.msra.mxu3 %v1323_v27  ;;  %v1347_v27 = vor.u32 %v1449_v25, %v1346_v24 }
 0x2bd   : > { %983 = vmatpush.bf16.msra.mxu0 %v1399_v6  ;;  %v1359_v6 = vor.u32 %v1450_v63, %v1356_v0 }
 0x2be   : > { %971 = vmatpush.bf16.msra.mxu2 %v1327_v28  ;;  %v1348_v28 = vld [vmem:[%s2182_s6 + $0x98] sm:$0xf0] }
 0x2bf   : > { %v1351_v29 = vor.u32 %v1448_v26, %v1348_v28 }
 0x2c0   : > { %946 = vmatpush.bf16.msra.mxu3 %v1315_v38  ;;  %v1446_v38 = vld [vmem:[%s2182_s6 + $0x84] sm:$0xf] }
 0x2c1   : > { %984 = vmatpush.bf16.msra.mxu0 %v1391_v14  ;;  %v534_v14 = vperm.slane %v490_v5, 1 }
 0x2c2   : > { %972 = vmatpush.bf16.msra.mxu2 %v1319_v41  ;;  %v1343_v41 = vor.u32 %v1446_v38, %v1340_v40 }
 0x2c4   : > { %947 = vmatpush.bf16.msra.mxu3 %v1307_v56 }
 0x2c5   : > { %985 = vmatpush.bf16.msra.mxu0 %v1383_v31  ;;  %v1435_v31 = vld [vmem:[%s2182_s6 + $0x24] sm:$0xf0] }
 0x2c6   : > { %973 = vmatpush.bf16.msra.mxu2 %v1311_v58  ;;  %v1291_v33 = vor.u32 %v1435_v31, %v1290_v30  ;;  %v566_v58 = vperm.slane %v563_v57, 1 }
 0x2c9   : > { %986 = vmatpush.bf16.msra.mxu0 %v1375_v46  ;;  %v1284_v46 = vld [vmem:[%s2182_s6 + $0x18] sm:$0xf0] }
 0x2ca   : > { %974 = vmatpush.bf16.msra.mxu2 %v1303_v23 }
 0x2cd   : > { %987 = vmatpush.bf16.msra.mxu0 %v1367_v60 }
 0x2ce   : > { %975 = vmatpush.bf16.msra.mxu2 %v1295_v35 }
 0x2d1   : > { %988 = vmatpush.bf16.msra.mxu0 %v1359_v6 }
 0x2d5   : > { %989 = vmatpush.bf16.msra.mxu0 %v1351_v29 }
 0x2d9   : > { %990 = vmatpush.bf16.msra.mxu0 %v1343_v41 }
 0x328   : > { %v510_v61 = vpop.xlane.xlu1 %509 }
 0x329   : > { %v511_v1 = vmul.f32 %v510_v61, %v1760_v48  ;;  %v1354_v61 = vld [vmem:[%s2182_s6 + $0xa0] sm:$0xf] }
 0x32a   : > { %v1355_v3 = vor.u32 %v1451_v62, %v1354_v61  ;;  %v565_v62 = vperm.slane %v563_v57, 0 }
 0x32b   : > { %v1920_v10 = vadd.f32 1e-05, %v511_v1 }
 0x32c   : > { %962 = vmatpush.bf16.msra.mxu1 %v1355_v3 }
 0x32d   : > { %1515 = vrsqrt.f32 %v1920_v10  ;;  %vm519_vm7 = vweird.f32 %v1920_v10 }
 0x330   : > { %963 = vmatpush.bf16.msra.mxu1 %v1347_v27 }
 0x333   : > { %v1516_v39 = vpop.eup %1515 }
 0x334   : > { %v514_v45 = vmul.f32 %v1516_v39, %v1920_v10  ;;  %vm520_vm6 = vweird.f32 %v1516_v39 }
 0x335   : > { %vm521_vm8 = vmor %vm519_vm7, %vm520_vm6 }
 0x336   : > { %v515_v55 = vmul.f32 %v1516_v39, %v514_v45  ;;  %v1432_v45 = vld [vmem:[%s2182_s6 + $0x14] sm:$0xf] }
 0x337   : > { %v1287_v47 = vor.u32 %v1432_v45, %v1284_v46 }
 0x338   : > { %v516_v59 = vmul.f32 0.5, %v515_v55  ;;  %v1276_v55 = vld [vmem:[%s2182_s6 + $0x8] sm:$0xf0] }
 0x339   : > { %976 = vmatpush.bf16.msra.mxu2 %v1287_v47  ;;  %v1279_v56 = vor.u32 %v1430_v53, %v1276_v55 }
 0x33a   : > { %v517_v1 = vsub.f32 1.5, %v516_v59 }
 0x33c   : > { %v518_v4 = vmul.f32 %v1516_v39, %v517_v1 }
 0x33d   : > { %977 = vmatpush.bf16.msra.mxu2 %v1279_v56 }
 0x33e   : > { %v522_v9 = vsel %vm521_vm8, %v1516_v39, %v518_v4  ;;  %v1339_v39 = vor.u32 %v1447_v37, %v1338_v36 }
 0x33f   : > { %v523_v11 = vmul.f32 %v522_v9, %v1763_v51  ;;  %v524_v12 = vmul.f32 %v522_v9, %v1765_v52  ;;  %v1298_v51 = vld [vmem:[%s2182_s6 + $0x30] sm:$0xf]  ;;  %v1437_v52 = vld [vmem:[%s2182_s6 + $0x34] sm:$0xf0] }
 0x340   : > { %v1299_v21 = vor.u32 %v1437_v52, %v1298_v51  ;;  %964 = vmatpush.bf16.msra.mxu1 %v1339_v39 }
 0x341   : > { %v530_v15 = vmul.f32 %v526_v7, %v523_v11  ;;  %v531_v10 = vmul.f32 %v527_v8, %v524_v12 }
 0x342   : > { %948 = vmatpush.bf16.msra.mxu3 %v1299_v21 }
 0x343   : > { %v2026_v16 = vadd.f32 %v533_v13, %v530_v15  ;;  %v2028_v17 = vadd.f32 %v534_v14, %v531_v10  ;;  %v778_v15 = vld [vmem:[%s2183_s7] sm:$0x3] }
 0x344   : > { %v781_v51 = vperm.slane %v778_v15, 1 }
 0x345   : > { %v539_v18 = vpack.c.bf16 %v2026_v16, %v2026_v16  ;;  %v540_v19 = vpack.c.bf16 %v2028_v17, %v2028_v17 }
 0x346   : > { %949 = vmatpush.bf16.msra.mxu3 %v1291_v33 }
 0x347   : > { %698 = vmatmul.bf16.vlgmr.msrb.gmra.mxu2 %v539_v18  ;;  %1270 = vmatmul.msk.bf16.vlgmr.msrb.gmra.mxu3 %vm409_vm0, %v540_v19 }
 0x348   : > { %724 = vmatmul.bf16.vlgmr.msrb.gmra.mxu0 %v539_v18  ;;  %1271 = vmatmul.msk.bf16.vlgmr.msrb.gmra.mxu1 %vm409_vm0, %v540_v19  ;;  %v780_v19 = vperm.slane %v778_v15, 0 }
 0x34a   : > { %950 = vmatpush.bf16.msra.mxu3 %v1283_v44 }
 0x34e   : > { %951 = vmatpush.bf16.msra.mxu3 %v1275_v54 }
 0x3c5   : > { %v725_v59 = vpop.f32.mrf.mxu0  ;;  %v738_v60 = vpop.f32.mrf.mxu1 }
 0x3c6   : > { %v726_v61 = vadd.f32 %v725_v59, %v566_v58 }
 0x3c8   : > { %v739_v63 = vadd.f32 %v738_v60, %v726_v61 }
 0x3ca   : > { %v743_v0 = vmax.f32 %v739_v63, 0.0  ;;  %v699_v1 = vpop.f32.mrf.mxu2  ;;  %v712_v2 = vpop.f32.mrf.mxu3 }
 0x3cb   : > { %v700_v3 = vadd.f32 %v699_v1, %v565_v62 }
 0x3cc   : > { %v745_v4 = vpack.c.bf16 %v743_v0, %v743_v0 }
 0x3cd   : > { %v713_v5 = vadd.f32 %v712_v2, %v700_v3  ;;  %v727_v6 = vpop.f32.mrf.mxu0  ;;  %v740_v7 = vpop.f32.mrf.mxu1 }
 0x3ce   : > { %965 = vmatmul.bf16.vlgmr.msra.gmra.mxu1 %v745_v4  ;;  %991 = vmatmul.bf16.vlgmr.msra.gmra.mxu0 %v745_v4 }
 0x3cf   : > { %v742_v8 = vmax.f32 %v713_v5, 0.0 }
 0x3d1   : > { %v744_v9 = vpack.c.bf16 %v742_v8, %v742_v8 }
 0x3d2   : > { %v701_v11 = vpop.f32.mrf.mxu2  ;;  %v714_v12 = vpop.f32.mrf.mxu3 }
 0x3d3   : > { %952 = vmatmul.bf16.vlgmr.msra.gmra.mxu3 %v744_v9  ;;  %978 = vmatmul.bf16.vlgmr.msra.gmra.mxu2 %v744_v9 }
 0x44b   : > { %v966_v13 = vpop.f32.mrf.mxu1  ;;  %v992_v14 = vpop.f32.mrf.mxu0 }
 0x453   : > { %v968_v10 = vpop.f32.mrf.mxu1  ;;  %v994_v18 = vpop.f32.mrf.mxu0 }
 0x456   : > { %v953_v52 = vpop.f32.mrf.mxu3  ;;  %v979_v20 = vpop.f32.mrf.mxu2 }
 0x457   : > { %v954_v21 = vadd.f32 %v953_v52, %v780_v19  ;;  %v980_v22 = vadd.f32 %v979_v20, %v781_v51 }
 0x459   : > { %v967_v23 = vadd.f32 %v966_v13, %v954_v21  ;;  %v993_v24 = vadd.f32 %v992_v14, %v980_v22 }
 0x45b   : > { %v996_v25 = vadd.f32 %v967_v23, %v2026_v16  ;;  %v997_v26 = vadd.f32 %v993_v24, %v2028_v17 }
 0x45d   : > { %v1000_v27 = vsel %vm409_vm0, %v997_v26, 0.0 }
 0x45e   : > { %v955_v28 = vpop.f32.mrf.mxu3  ;;  %v981_v29 = vpop.f32.mrf.mxu2  ;;  %v1001_v30 = vadd.f32 %v1000_v27, %v996_v25 }
 0x460   : > { %1002 = vadd.xlane.f32.xlu2 %v1001_v30 }
 0x4d3   : > { %v1003_v31 = vpop.xlane.xlu2 %1002 }
 0x4d4   : > { %v1004_v32 = vmul.f32 %v1003_v31, %v1760_v48 }
 0x4d6   : > { %v1005_v33 = vsub.f32 %v996_v25, %v1004_v32  ;;  %v1006_v34 = vsub.f32 %v997_v26, %v1004_v32 }
 0x4d8   : > { %v1007_v35 = vmul.f32 %v1005_v33, %v1005_v33  ;;  %v1008_v36 = vmul.f32 %v1006_v34, %v1006_v34 }
 0x4da   : > { %v1009_v16 = vsel %vm409_vm0, %v1008_v36, 0.0 }
 0x4db   : > { %v1010_v37 = vadd.f32 %v1009_v16, %v1007_v35 }
 0x4dd   : > { %1011 = vadd.xlane.f32.xlu2 %v1010_v37 }
 0x4de   : > { %1546 = shalt.err (!%p1543_p3)
}
 0x4df   : > { %1464 = dma.vmem_to_hbm [thread:$0]  (%p1715_p5), %s1077_s24, 128, %s1079_s0, %s1049_s1   ;;  %v998_v44 = vld [vmem:[%s2184_s8] sm:$0x3] }
 0x4e0   : > { %s1175_s25 = sshll.u32 %s1736_s22, 4  ;;  %s1462_s14 = sshll.u32 %s1698_s21, 4  ;;  %v1029_v47 = vperm.slane %v998_v44, 1  ;;  %v1028_v49 = vperm.slane %v998_v44, 0 }
 0x4e1   : > { %s1060_s0 = scalar_lea.hbm %s2186_s10, %s1462_s14  ;;  %s383_s21 = scalar_lea.vmem [#allocation2], %s1175_s25 }
 0x4e2   : > { %s1062_s1 = sshll.u32 %s383_s21, 4  ;;  %s1064_s29 = sshll.u32 %s1060_s0, 4  ;;  %s1063_s1 = int_to_ptr.vmem [resolvable:$true] %s1062_s1  ;;  %s1065_s29 = int_to_ptr.hbm [resolvable:$true] %s1064_s29 }
 0x4e3   : > { %s1044_s30 = scalar_lea.sflag [#allocation3], %s1736_s22  ;;  %s1561_s12 = sshra.s32 %s1065_s29, 4  ;;  %s1562_s12 = int_to_ptr.hbm [resolvable:$true] %s1561_s12 }
 0x4e4   : > { %s1563_s4 = scalar_lea.hbm %s1562_s12, 16  ;;  %s1567_s3 = scalar_lea.hbm %s2186_s10, 32 }
 0x4e5   : > { %p1564_p4 = scmp.ne.s32.totalorder %s1562_s12, %s1563_s4  ;;  %p1568_p9 = scmp.lt.s32.totalorder %s1562_s12, %s2186_s10 }
 0x4e6   : > { %p1569_p10 = scmp.lt.s32.totalorder %s1567_s3, %s1563_s4 }
 0x4e7   : > { %p1565_p7 = pnand %p1564_p4, %p1715_p5 }
 0x4e8   : > { %p1570_p11 = por %p1569_p10, %p1568_p9 }
 0x4e9   : > { %p1566_p8 = pneg %p1565_p7 }
 0x4eb   : > { %p1571_p12 = pnand %p1570_p11, %p1566_p8 }
 0x550   : > { %v1012_v17 = vpop.xlane.xlu2 %1011 }
 0x551   : > { %v1013_v38 = vmul.f32 %v1012_v17, %v1760_v48  ;;  %v999_v48 = vld [vmem:[%s2185_s9] sm:$0x3] }
 0x552   : > { %v1035_v55 = vperm.slane %v999_v48, 0  ;;  %v1036_v56 = vperm.slane %v999_v48, 1 }
 0x553   : > { %v1014_v39 = vadd.f32 1e-05, %v1013_v38 }
 0x555   : > { %1517 = vrsqrt.f32 %v1014_v39  ;;  %vm1021_vm10 = vweird.f32 %v1014_v39 }
 0x55b   : > { %v1518_v40 = vpop.eup %1517 }
 0x55c   : > { %v1016_v41 = vmul.f32 %v1518_v40, %v1014_v39  ;;  %vm1022_vm9 = vweird.f32 %v1518_v40 }
 0x55d   : > { %vm1023_vm11 = vmor %vm1021_vm10, %vm1022_vm9 }
 0x55e   : > { %v1017_v42 = vmul.f32 %v1518_v40, %v1016_v41 }
 0x560   : > { %v1018_v43 = vmul.f32 0.5, %v1017_v42 }
 0x562   : > { %v1019_v45 = vsub.f32 1.5, %v1018_v43 }
 0x564   : > { %v1020_v46 = vmul.f32 %v1518_v40, %v1019_v45 }
 0x566   : > { %v1024_v50 = vsel %vm1023_vm11, %v1518_v40, %v1020_v46 }
 0x567   : > { %v1025_v53 = vmul.f32 %v1024_v50, %v1005_v33  ;;  %v1026_v54 = vmul.f32 %v1024_v50, %v1006_v34 }
 0x569   : > { %v1033_v57 = vmul.f32 %v1029_v47, %v1026_v54  ;;  %v1032_v58 = vmul.f32 %v1028_v49, %v1025_v53 }
 0x56b   : > { %v1039_v59 = vadd.f32 %v1035_v55, %v1032_v58  ;;  %v1040_v60 = vadd.f32 %v1036_v56, %v1033_v57 }
 0x56d   : > { %1041 = vst [vmem:[%s383_s21] sm:$0xff] %v1039_v59 }
 0x56e   : > { %1042 = vst.msk [vmem:[%s383_s21 + $0x8] sm:$0xff] %vm409_vm0, %v1040_v60 }
 0x56f   : > { %1574 = shalt.err (!%p1571_p12)
}
 0x570   : > { %1463 = dma.vmem_to_hbm [thread:$0]  (%p1715_p5), %s1063_s1, 256, %s1065_s29, %s1044_s30  }
 0x571 PF: > { %p1474_p13 = scmp.ge.s32.totalorder %s1613_s20, 2  ;;  %s1090_s22 = sand.u32 1, %s1601_s17  }
 0x572   : > { %s1091_s15 = scalar_lea.sflag [#allocation3], %s1090_s22 }
 0x573   : > { %p1468_p0 = pnand %p1474_p13, %p1719_p6 }
 0x575   : > { %p1469_p1 = pneg %p1468_p0 }
 0x577   : > { %1592 = dma.done.wait (%p1469_p1), %s1091_s15, 256  }
 0x578   : > { %1594 = vsyncadd (%p1469_p1), %s1091_s15, 4294967040  ;;  %s1101_s16 = scalar_lea.sflag [#allocation5], %s1090_s22 }
 0x579   : > { %1596 = dma.done.wait (%p1469_p1), %s1101_s16, 128  }
 0x57a   : > { %1598 = vsyncadd (%p1469_p1), %s1101_s16, 4294967168  ;;  %s2201_s27 = sld [smem:[#allocation8_spill]]  ;;  %p25_p5 = scmp.ge.s32.totalorder %s1702_s23, 4  }
 0x57b   : > { %s2202_s17 = smov %s1605_s18  ;;  %s2203_s18 = smov %s1609_s19 }
 0x57c   : > { %s2205_s20 = smov %s1702_s23  ;;  %27 = sbr.rel (!%p25_p5) target bundleno = 11 (0xb), region = 112 }
 0x580   : > { %s2204_s19 = smov %s2201_s27 }
 0x581   :  { %1107 = vsyncpa [#allocation3], 1 }
 0x582   :  { %1109 = vsyncpa [#allocation3 + $0x1], 1 }
 0x583   :  { %1110 = vsyncpa [#allocation5], 1 }
 0x584   :  { %1112 = vsyncpa [#allocation5 + $0x1], 1 }

</bundles_post_ra>
